<compile_context>
chip_gen: v7x
topology: tpu7x:2x2x1
jax: 0.10.0
libtpu: 0.0.40
codegen_flags: <defaults>
</compile_context>

<pallas_src>
import functools

import jax
import jax.numpy as jnp
from jax import lax
from jax.experimental import pallas as pl
from jax.experimental.pallas import tpu as pltpu

_VMEM_LIMIT = 48 * 1024 * 1024      # scoped VMEM cap (<= 64 MiB physical on v7x)
_VMEM_BUDGET = 24 * 1024 * 1024     # what the tile chooser actually targets


def _channel_chunk(c, itemsize):
    # Sublane-aligned channel chunk: 8 rows for f32, 16 for bf16, 32 for fp8.
    return min(c, max(8, 32 // max(int(itemsize), 1)))


def _choose_hw_tile(hw, c, itemsize, chunk, budget=_VMEM_BUDGET):
    """Lanes per tile: multiple of 128 (or full HW), sized from a VMEM budget."""
    # Per-lane VMEM estimate: 2 inputs x 2 pipeline buffers x C x itemsize for
    # the streamed tiles, 3 f32 (1, T) accumulators, ~4 chunk-sized f32
    # temporaries from the per-chunk upcast / products.
    per_lane = 4 * c * itemsize + 3 * 4 + 4 * 4 * min(chunk, c)
    lanes = budget // per_lane
    if lanes >= hw or hw <= 128:
        return hw
    lanes = max((lanes // 128) * 128, 128)
    lanes = min(lanes, (hw // 128) * 128)
    return max(lanes, 128)


def _cos_loss_tile(p_ref, t_ref, *, eps, chunk):
    """p_ref, t_ref: (1, C, T) refs. Returns (1, T) f32 = 1 - cos_sim over C."""
    _, c, _ = p_ref.shape
    dot = p2 = t2 = None
    for start in range(0, c, chunk):          # static chunking over channels
        size = min(chunk, c - start)
        p = p_ref[:, start:start + size, :].astype(jnp.float32)
        t = t_ref[:, start:start + size, :].astype(jnp.float32)
        d = jnp.sum(p * t, axis=1)
        pp = jnp.sum(p * p, axis=1)
        tt = jnp.sum(t * t, axis=1)
        if dot is None:
            dot, p2, t2 = d, pp, tt
        else:
            dot, p2, t2 = dot + d, p2 + pp, t2 + tt
    # Per-norm clamp (F.cosine_similarity semantics), two EUP rsqrts.
    e2 = eps * eps
    inv = lax.rsqrt(jnp.maximum(p2, e2)) * lax.rsqrt(jnp.maximum(t2, e2))
    return 1.0 - dot * inv


def _partial_sum_kernel(p_ref, t_ref, o_ref, *, hw, hw_t, eps, chunk):
    # p_ref, t_ref: (1, C, hw_t) blocks; o_ref: (8, 128) resident accumulator.
    j = pl.program_id(1)

    @pl.when(j == 0)
    def _init():
        o_ref[...] = jnp.zeros_like(o_ref)

    loss = _cos_loss_tile(p_ref, t_ref, eps=eps, chunk=chunk)   # (1, hw_t) f32

    if hw % hw_t != 0:
        # Mask out-of-range lanes of the last ragged tile before summing.
        lane = lax.broadcasted_iota(jnp.int32, loss.shape, 1)
        loss = jnp.where(j * hw_t + lane < hw, loss, 0.0)

    # Broadcast-accumulate the tile partial sum; every element of the batch's
    # (8,128) block ends up holding the full per-batch sum.
    o_ref[...] += jnp.sum(loss)


def _elementwise_kernel(p_ref, t_ref, o_ref, *, scale_factor,
                        lowest_loss_value, eps, chunk):
    # p_ref, t_ref: (1, C, hw_t); o_ref: (1, 1, hw_t) per-element loss.
    loss = _cos_loss_tile(p_ref, t_ref, eps=eps, chunk=chunk) * scale_factor
    if lowest_loss_value is not None:
        loss = jnp.abs(loss - lowest_loss_value) + lowest_loss_value
    o_ref[...] = loss.reshape(o_ref.shape).astype(o_ref.dtype)


def cosine_similarity_loss(prediction, target, *, scale_factor=1.0,
                           reduction='mean', lowest_loss_value=None,
                           eps=1e-8, hw_tile=None):
    """prediction, target: NCHW arrays (any float dtype), identical shapes."""
    assert prediction.shape == target.shape
    assert prediction.ndim == 4
    n, c, h, w = prediction.shape
    hw = h * w
    itemsize = jnp.dtype(prediction.dtype).itemsize
    chunk = _channel_chunk(c, itemsize)
    p3 = prediction.reshape(n, c, hw)
    t3 = target.reshape(n, c, hw)

    if hw_tile is not None:
        assert hw_tile % 128 == 0
        hw_t = hw if hw <= hw_tile else hw_tile
    else:
        hw_t = _choose_hw_tile(hw, c, itemsize, chunk)
    grid_hw = pl.cdiv(hw, hw_t)

    flops = 8 * n * c * hw
    transcendentals = 2 * n * hw

    if reduction not in ('mean', 'sum'):
        # Per-element loss path: (N, HW_tiles) parallel grid, output emitted
        # in the input dtype, viewed as (N, 1, HW) for a legal (1,1,hw_t) block.
        out = pl.pallas_call(
            functools.partial(_elementwise_kernel,
                              scale_factor=float(scale_factor),
                              lowest_loss_value=lowest_loss_value,
                              eps=float(eps), chunk=chunk),
            out_shape=jax.ShapeDtypeStruct((n, 1, hw), prediction.dtype),
            grid=(n, grid_hw),
            in_specs=[pl.BlockSpec((1, c, hw_t), lambda i, j: (i, 0, j)),
                      pl.BlockSpec((1, c, hw_t), lambda i, j: (i, 0, j))],
            out_specs=pl.BlockSpec((1, 1, hw_t), lambda i, j: (i, 0, j)),
            compiler_params=pltpu.CompilerParams(
                dimension_semantics=("parallel", "parallel"),
                vmem_limit_bytes=_VMEM_LIMIT),
            cost_estimate=pl.CostEstimate(
                flops=flops, transcendentals=transcendentals,
                bytes_accessed=2 * n * c * hw * itemsize + n * hw * itemsize),
        )(p3, t3)
        return out.reshape(n, h, w)

    # Scalar ('mean' / 'sum') path: the output block (one (8,128) tile per
    # batch element) is revisited across the HW axis and used as accumulator.
    partials = pl.pallas_call(
        functools.partial(_partial_sum_kernel, hw=hw, hw_t=hw_t,
                          eps=float(eps), chunk=chunk),
        out_shape=jax.ShapeDtypeStruct((n * 8, 128), jnp.float32),
        grid=(n, grid_hw),
        in_specs=[pl.BlockSpec((1, c, hw_t), lambda i, j: (i, 0, j)),
                  pl.BlockSpec((1, c, hw_t), lambda i, j: (i, 0, j))],
        out_specs=pl.BlockSpec((8, 128), lambda i, j: (i, 0)),
        compiler_params=pltpu.CompilerParams(
            dimension_semantics=("parallel", "arbitrary"),
            vmem_limit_bytes=_VMEM_LIMIT),
        cost_estimate=pl.CostEstimate(
            flops=flops, transcendentals=transcendentals,
            bytes_accessed=2 * n * c * hw * itemsize + n * 8 * 128 * 4),
    )(p3, t3)

    per_batch = partials[0::8, 0]              # (n,) per-batch sums
    total = jnp.sum(per_batch)
    if reduction == 'mean':
        total = total / float(n * hw)
    total = total * scale_factor
    if lowest_loss_value is not None:
        total = jnp.abs(total - lowest_loss_value) + lowest_loss_value
    return total


def _reference(prediction, target, *, scale_factor=1.0, reduction='mean',
               lowest_loss_value=None, eps=1e-8):
    p = prediction.astype(jnp.float32)
    t = target.astype(jnp.float32)
    dot = jnp.sum(p * t, axis=1)
    pn = jnp.maximum(jnp.linalg.norm(p, axis=1), eps)
    tn = jnp.maximum(jnp.linalg.norm(t, axis=1), eps)
    loss = 1.0 - dot / (pn * tn)
    if reduction == 'mean':
        loss = jnp.mean(loss)
    elif reduction == 'sum':
        loss = jnp.sum(loss)
    loss = loss * scale_factor
    if lowest_loss_value is not None:
        loss = jnp.abs(loss - lowest_loss_value) + lowest_loss_value
    return loss


if __name__ == "__main__":
    key = jax.random.PRNGKey(0)
    k1, k2, k3, k4 = jax.random.split(key, 4)

    # NCHW: batch=2, channels=4, spatial=16x16
    pred = jax.random.normal(k1, (2, 4, 16, 16), dtype=jnp.float32)
    tgt = jax.random.normal(k2, (2, 4, 16, 16), dtype=jnp.float32)

    # mean reduction
    out = jax.block_until_ready(cosine_similarity_loss(pred, tgt))
    ref = _reference(pred, tgt)
    assert jnp.allclose(out, ref, atol=1e-5, rtol=1e-5), (out, ref)

    # sum reduction + scale_factor + lowest_loss_value
    out = jax.block_until_ready(cosine_similarity_loss(
        pred, tgt, scale_factor=0.5, reduction='sum', lowest_loss_value=10.0))
    ref = _reference(pred, tgt, scale_factor=0.5, reduction='sum',
                     lowest_loss_value=10.0)
    assert jnp.allclose(out, ref, atol=1e-4, rtol=1e-5), (out, ref)

    # reduction='none' (per-element (N, H, W) loss)
    out = jax.block_until_ready(cosine_similarity_loss(
        pred, tgt, reduction='none', scale_factor=2.0))
    ref = _reference(pred, tgt, reduction='none', scale_factor=2.0)
    assert out.shape == (2, 16, 16), out.shape
    assert jnp.allclose(out, ref, atol=1e-5, rtol=1e-5)

    # ragged multi-tile scalar path (HW=320, forced 128-lane tiles -> mask)
    pred2 = jax.random.normal(k3, (2, 4, 16, 20), dtype=jnp.float32)
    tgt2 = jax.random.normal(k4, (2, 4, 16, 20), dtype=jnp.float32)
    out = jax.block_until_ready(cosine_similarity_loss(pred2, tgt2,
                                                       hw_tile=128))
    ref = _reference(pred2, tgt2)
    assert jnp.allclose(out, ref, atol=1e-5, rtol=1e-5), (out, ref)

    # ragged multi-tile 'none' path (write-clipping on the last HW block)
    out = jax.block_until_ready(cosine_similarity_loss(
        pred2, tgt2, reduction='none', hw_tile=128))
    ref = _reference(pred2, tgt2, reduction='none')
    assert out.shape == (2, 16, 20), out.shape
    assert jnp.allclose(out, ref, atol=1e-5, rtol=1e-5)

    # bf16 inputs streamed as bf16 (kernel upcasts per channel chunk)
    out = jax.block_until_ready(cosine_similarity_loss(
        pred.astype(jnp.bfloat16), tgt.astype(jnp.bfloat16)))
    ref = _reference(pred.astype(jnp.bfloat16), tgt.astype(jnp.bfloat16))
    assert jnp.allclose(out, ref, atol=1e-4, rtol=1e-4), (out, ref)

    print("KERNEL_OK")
</pallas_src>

<mosaic_0001>
module attributes {stable_mosaic.version = 11 : i64} {
  func.func @_partial_sum_kernel(%arg0: i32, %arg1: i32, %arg2: memref<1x4x256xf32, #tpu.memory_space<vmem>>, %arg3: memref<1x4x256xf32, #tpu.memory_space<vmem>>, %arg4: memref<8x128xf32, #tpu.memory_space<vmem>>) attributes {dimension_semantics = [#tpu.dimension_semantics<parallel>, #tpu.dimension_semantics<arbitrary>], iteration_bounds = array<i64: 2, 1>, scalar_prefetch = 0 : i64, scratch_operands = 0 : i64, tpu.core_type = #tpu.core_type<tc>, window_params = [{transform_indices = @transform_0, window_bounds = array<i64: 1, 4, 256>}, {transform_indices = @transform_1, window_bounds = array<i64: 1, 4, 256>}, {transform_indices = @transform_2, window_bounds = array<i64: 8, 128>}]} {
    %c0_i32 = arith.constant 0 : i32
    %0 = arith.cmpi eq, %arg1, %c0_i32 : i32
    %1 = arith.extui %0 : i1 to i32
    %c0_i32_0 = arith.constant 0 : i32
    %2 = arith.cmpi ne, %1, %c0_i32_0 : i32
    scf.if %2 {
      %cst_16 = arith.constant 0.000000e+00 : f32
      %29 = vector.broadcast %cst_16 : f32 to vector<8x128xf32>
      %c0_17 = arith.constant 0 : index
      %c0_18 = arith.constant 0 : index
      %30 = vector.load %arg4[%c0_17, %c0_18] : memref<8x128xf32, #tpu.memory_space<vmem>>, vector<8x128xf32>
      tpu.vector_store %arg4[%c0_17, %c0_18], %29 {strides = array<i32>} : memref<8x128xf32, #tpu.memory_space<vmem>>, vector<8x128xf32>,
    } else {
    }
    %c0 = arith.constant 0 : index
    %c0_1 = arith.constant 0 : index
    %c0_2 = arith.constant 0 : index
    %3 = vector.load %arg2[%c0, %c0_1, %c0_2] : memref<1x4x256xf32, #tpu.memory_space<vmem>>, vector<1x4x256xf32>
    %c0_3 = arith.constant 0 : index
    %c0_4 = arith.constant 0 : index
    %c0_5 = arith.constant 0 : index
    %4 = vector.load %arg3[%c0_3, %c0_4, %c0_5] : memref<1x4x256xf32, #tpu.memory_space<vmem>>, vector<1x4x256xf32>
    %5 = arith.mulf %3, %4 : vector<1x4x256xf32>
    %cst = arith.constant dense<0.000000e+00> : vector<1x256xf32>
    %6 = vector.multi_reduction <add>, %5, %cst [1] : vector<1x4x256xf32> to vector<1x256xf32>
    %7 = arith.mulf %3, %3 : vector<1x4x256xf32>
    %cst_6 = arith.constant dense<0.000000e+00> : vector<1x256xf32>
    %8 = vector.multi_reduction <add>, %7, %cst_6 [1] : vector<1x4x256xf32> to vector<1x256xf32>
    %9 = arith.mulf %4, %4 : vector<1x4x256xf32>
    %cst_7 = arith.constant dense<0.000000e+00> : vector<1x256xf32>
    %10 = vector.multi_reduction <add>, %9, %cst_7 [1] : vector<1x4x256xf32> to vector<1x256xf32>
    %cst_8 = arith.constant 1.000000e-16 : f32
    %11 = vector.broadcast %cst_8 : f32 to vector<1x256xf32>
    %12 = arith.maximumf %8, %11 : vector<1x256xf32>
    %13 = math.rsqrt %12 : vector<1x256xf32>
    %cst_9 = arith.constant 1.000000e-16 : f32
    %14 = vector.broadcast %cst_9 : f32 to vector<1x256xf32>
    %15 = arith.maximumf %10, %14 : vector<1x256xf32>
    %16 = math.rsqrt %15 : vector<1x256xf32>
    %17 = arith.mulf %13, %16 : vector<1x256xf32>
    %18 = arith.mulf %6, %17 : vector<1x256xf32>
    %cst_10 = arith.constant 1.000000e+00 : f32
    %19 = vector.broadcast %cst_10 : f32 to vector<1x256xf32>
    %20 = arith.subf %19, %18 : vector<1x256xf32>
    %c0_11 = arith.constant 0 : index
    %c0_12 = arith.constant 0 : index
    %21 = vector.load %arg4[%c0_11, %c0_12] : memref<8x128xf32, #tpu.memory_space<vmem>>, vector<8x128xf32>
    %22 = vector.shape_cast %20 : vector<1x256xf32> to vector<1x1x256xf32>
    %cst_13 = arith.constant dense<0.000000e+00> : vector<1xf32>
    %23 = vector.multi_reduction <add>, %22, %cst_13 [1, 2] : vector<1x1x256xf32> to vector<1xf32>
    %24 = vector.shape_cast %23 : vector<1xf32> to vector<1x1x1xf32>
    %25 = vector.extract %24[0, 0, 0] : f32 from vector<1x1x1xf32>
    %26 = vector.broadcast %25 : f32 to vector<8x128xf32>
    %27 = arith.addf %21, %26 : vector<8x128xf32>
    %c0_14 = arith.constant 0 : index
    %c0_15 = arith.constant 0 : index
    %28 = vector.load %arg4[%c0_14, %c0_15] : memref<8x128xf32, #tpu.memory_space<vmem>>, vector<8x128xf32>
    tpu.vector_store %arg4[%c0_14, %c0_15], %27 {strides = array<i32>} : memref<8x128xf32, #tpu.memory_space<vmem>>, vector<8x128xf32>,
    return
  }
  func.func @transform_0(%arg0: i32, %arg1: i32) -> (i32, i32, i32) {
    %c0_i32 = arith.constant 0 : i32
    %c0_i32_0 = arith.constant 0 : i32
    return %arg0, %c0_i32, %arg1 : i32, i32, i32
  }
  func.func @transform_1(%arg0: i32, %arg1: i32) -> (i32, i32, i32) {
    %c0_i32 = arith.constant 0 : i32
    %c0_i32_0 = arith.constant 0 : i32
    return %arg0, %c0_i32, %arg1 : i32, i32, i32
  }
  func.func @transform_2(%arg0: i32, %arg1: i32) -> (i32, i32) {
    %c0_i32 = arith.constant 0 : i32
    %c0_i32_0 = arith.constant 0 : i32
    return %arg0, %c0_i32 : i32, i32
  }
}

</mosaic_0001>

<bundles_post_ra>
// kernel: tpu_custom_call.1
= control target key start
LH: loop header
LB: loop body
LE: loop exit
PB: predicated region body
PF: predicated region fallthrough
CT: control target
= control target key end

     0   :  { %7 = vsyncpa [#allocation3], 0  ;;  %s929_s0 = inlined_call_operand.hbm [shape: f32[2,4,256], index: 0, kind: input, shape index: {}]   ;;  %s930_s1 = inlined_call_operand.hbm [shape: f32[2,4,256], index: 1, kind: input, shape index: {}]   ;;  %s931_s2 = inlined_call_operand.hbm [shape: f32[16,128], index: 2, kind: output, shape index: {}]  }
   0x1   :  { %9 = vsyncpa [#allocation3 + $0x1], 0 }
   0x2   :  { %10 = vsyncpa [#allocation6], 0 }
   0x3   :  { %12 = vsyncpa [#allocation6 + $0x1], 0 }
   0x4   :  { %13 = vsyncpa [#allocation4], 0 }
   0x5   :  { %15 = vsyncpa [#allocation4 + $0x1], 0  ;;  %s698_s9 = smov 0   ;;  %s700_s10 = smov 0  }
   0x6   :  { %s702_s11 = smov 0   ;;  %s704_s12 = smov 0  }
   0x7   :  { %s706_s13 = smov 0   ;;  %s708_s14 = smov 0  }
   0x8 LB: > { %s434_s15 = sadd.s32 4294967295, %s678_s14   ;;  %s435_s16 = sadd.s32 4294967294, %s678_s14   ;;  %s678_s14 = sphi %s708_s14, %s21_s14   ;;  %s674_s13 = sphi %s706_s13, %s951_s13   ;;  %s670_s12 = sphi %s704_s12, %s950_s12   ;;  %s666_s11 = sphi %s702_s11, %s949_s11   ;;  %s662_s10 = sphi %s700_s10, %s948_s10   ;;  %s658_s9 = sphi %s698_s9, %s947_s9  }
   0x9   : > { %s33_s17 = sadd.s32 1, %s674_s13  ;;  %s42_s18 = sadd.s32 1, %s666_s11 }
   0xa   : > { %p35_p0 = scmp.ge.s32.totalorder %s33_s17, 2  ;;  %p49_p1 = scmp.ne.s32.totalorder %s666_s11, %s662_s10 }
   0xb   : > { %p50_p2 = scmp.eq.s32.totalorder %s678_s14, 0  ;;  %p55_p3 = scmp.ne.s32.totalorder %s662_s10, %s658_s9 }
   0xc   : > { %s953_s17 = smov (%p35_p0, %s33_s17), 0  ;;  %p56_p5 = scmp.eq.s32.totalorder %s434_s15, 0 }
   0xd   : > { %p739_p4 = por %p50_p2, %p49_p1  ;;  %s37_s20 = ssub.s32 %s674_s13, %s953_s17 }
   0xe   : > { %p107_p6 = scmp.eq.s32.totalorder %s434_s15, 1  ;;  %p40_p7 = scmp.eq.s32.totalorder %s37_s20, 0 }
   0xf   : > { %p745_p8 = por %p56_p5, %p55_p3  ;;  %p113_p10 = scmp.eq.s32.totalorder %s435_s16, 1 }
  0x10   : > { %p749_p9 = por %p107_p6, %p49_p1  ;;  %p473_p13 = scmp.lt.s32.totalorder %s678_s14, 2 }
  0x11   : > { %s935_s21 = scalar_select %p745_p8, 1, 0 }
  0x12   : > { %s936_s22 = scalar_select %p749_p9, 1, 0 }
  0x13   : > { %s754_s23 = scalar_select %p40_p7, %s666_s11, %s42_s18  }
  0x14   : > { %p756_p11 = por %p113_p10, %p55_p3  ;;  %s763_s25 = sand.u32 1, %s666_s11  }
  0x15   : > { %s438_s26 = sshll.u32 %s763_s25, 3  ;;  %s452_s27 = sshll.u32 %s674_s13, 7 }
  0x16   : > { %s937_s24 = scalar_select %p756_p11, 1, 0 }
  0x17   : > { %s772_s30 = scalar_lea.hbm %s929_s0, %s452_s27  ;;  %s137_s3 = scalar_lea.vmem [#allocation2], %s438_s26 }
  0x18   : > { %s147_s4 = sshll.u32 %s137_s3, 4  ;;  %p780_p0 = pnand %p473_p13, %p739_p4  ;;  %s776_s4 = int_to_ptr.vmem [resolvable:$true] %s147_s4 }
  0x19   : > { %s134_s6 = scalar_lea.sflag [#allocation3], %s763_s25  ;;  %s532_s7 = scalar_lea.hbm %s772_s30, 128 }
  0x1a   : > { %p533_p3 = scmp.ne.s32.totalorder %s772_s30, %s532_s7  ;;  %p534_p5 = pneg %p780_p0 }
  0x1b   : > { %s537_s16 = scalar_lea.hbm %s929_s0, 256  ;;  %p538_p4 = scmp.lt.u32.totalorder %s772_s30, %s929_s0 }
  0x1c   : > { %p535_p6 = pnand %p534_p5, %p533_p3  ;;  %p539_p10 = scmp.lt.u32.totalorder %s537_s16, %s532_s7 }
  0x1d   : > { %p541_p12 = scmp.lt.u32.totalorder %s532_s7, %s772_s30 }
  0x1e   : > { %p536_p7 = pneg %p535_p6  ;;  %p540_p13 = por %p539_p10, %p538_p4 }
  0x20   : > { %p542_p1 = por %p541_p12, %p540_p13 }
  0x22   : > { %p543_p2 = pnand %p542_p1, %p536_p7 }
  0x24   : > { %546 = shalt.err (!%p543_p2)
}
  0x25   : > { %s547_s20 = scalar_lea.vmem %s776_s4, 128  ;;  %s680_s28 = smov [#allocation2]  }
  0x26   : > { %p548_p3 = scmp.ne.s32.totalorder %s776_s4, %s547_s20  ;;  %s552_s29 = sshll.u32 %s680_s28, 4  ;;  %s553_s29 = int_to_ptr.vmem [resolvable:$false] %s552_s29 }
  0x27   : > { %s554_s3 = scalar_lea.vmem %s553_s29, 256  ;;  %p555_p9 = scmp.lt.s32.totalorder %s776_s4, %s553_s29 }
  0x28   : > { %p550_p6 = pnand %p548_p3, %p534_p5  ;;  %p556_p4 = scmp.lt.s32.totalorder %s554_s3, %s547_s20 }
  0x2a   : > { %p551_p11 = pneg %p550_p6  ;;  %p557_p10 = por %p556_p4, %p555_p9 }
  0x2c   : > { %p558_p12 = pnand %p557_p10, %p551_p11 }
  0x2e   : > { %561 = shalt.err (!%p558_p12)
}
  0x2f   : > { %465 = dma.hbm_to_vmem [thread:$0]  (!%p780_p0), %s772_s30, 128, %s776_s4, %s134_s6  }
  0x30   : > { %p939_p1 = scmp.lt.s32.totalorder %s678_s14, 3  ;;  %p940_p2 = scmp.ge.s32.totalorder %s678_s14, 1 }
  0x31   : > { %s825_s16 = scalar_lea.hbm %s930_s1, %s452_s27  ;;  %s158_s18 = scalar_lea.vmem [#allocation5], %s438_s26 }
  0x32   : > { %p816_p7 = pnand %p940_p2, %p939_p1  ;;  %s168_s19 = sshll.u32 %s158_s18, 4  ;;  %s169_s19 = int_to_ptr.vmem [resolvable:$true] %s168_s19 }
  0x33   : > { %s155_s30 = scalar_lea.sflag [#allocation6], %s763_s25  ;;  %s562_s4 = scalar_lea.hbm %s825_s16, 128 }
  0x34   : > { %s941_s7 = scalar_select %p816_p7, 1, 0 }
  0x35   : > { %p563_p9 = scmp.ne.s32.totalorder %s825_s16, %s562_s4  ;;  %s567_s27 = scalar_lea.hbm %s930_s1, 256 }
  0x36   : > { %p568_p3 = scmp.lt.u32.totalorder %s825_s16, %s930_s1  ;;  %p569_p6 = scmp.lt.u32.totalorder %s567_s27, %s562_s4 }
  0x37   : > { %p565_p11 = pnand %p563_p9, %p534_p5  ;;  %p571_p10 = scmp.lt.u32.totalorder %s562_s4, %s825_s16 }
  0x38   : > { %p570_p4 = por %p569_p6, %p568_p3 }
  0x39   : > { %p566_p13 = pneg %p565_p11 }
  0x3a   : > { %p572_p12 = por %p571_p10, %p570_p4 }
  0x3c   : > { %p573_p1 = pnand %p572_p12, %p566_p13 }
  0x3e   : > { %576 = shalt.err (!%p573_p1)
}
  0x3f   : > { %s577_s25 = scalar_lea.vmem %s169_s19, 128  ;;  %s681_s26 = smov [#allocation5]  }
  0x40   : > { %p578_p2 = scmp.ne.s32.totalorder %s169_s19, %s577_s25  ;;  %s582_s3 = sshll.u32 %s681_s26, 4  ;;  %s583_s3 = int_to_ptr.vmem [resolvable:$false] %s582_s3 }
  0x41   : > { %s584_s8 = scalar_lea.vmem %s583_s3, 256  ;;  %p585_p8 = scmp.lt.s32.totalorder %s169_s19, %s583_s3 }
  0x42   : > { %p580_p9 = pnand %p578_p2, %p534_p5  ;;  %p586_p7 = scmp.lt.s32.totalorder %s584_s8, %s577_s25 }
  0x44   : > { %p581_p11 = pneg %p580_p9  ;;  %p587_p3 = por %p586_p7, %p585_p8 }
  0x46   : > { %p588_p6 = pnand %p587_p3, %p581_p11 }
  0x48   : > { %591 = shalt.err (!%p588_p6)
}
  0x49   : > { %468 = dma.hbm_to_vmem [thread:$0]  (!%p780_p0), %s825_s16, 128, %s169_s19, %s155_s30  }
  0x4a   : > { %p942_p13 = scmp.ne.s32.totalorder %s941_s7, 0 }
  0x4b   : > { %s852_s15 = sand.u32 (!%p942_p13), 1, %s662_s10   ;;  %p943_p8 = scmp.ne.s32.totalorder (!%p942_p13), %s935_s21, 0 }
  0x4c   : > { %177 = sbr.rel (%p942_p13) target bundleno = 346 (0x15a), region = 28  ;;  %s855_s18 = sshll.u32 (!%p942_p13), %s852_s15, 3 }
  0x4d   : > { %s180_s4 = scalar_lea.sflag (!%p942_p13), [#allocation3], %s852_s15  ;;  %s183_s6 = scalar_lea.vmem (!%p942_p13), [#allocation2], %s855_s18 }
  0x53   : > { %645 = dma.done.wait (%p943_p8), %s180_s4, 128  }
  0x54   : > { %647 = vsyncadd (%p943_p8), %s180_s4, 4294967168  ;;  %s189_s5 = scalar_lea.sflag [#allocation6], %s852_s15  ;;  %s192_s7 = scalar_lea.vmem [#allocation5], %s855_s18 }
  0x55   : > { %649 = dma.done.wait (%p943_p8), %s189_s5, 128  }
  0x56   : > { %651 = vsyncadd (%p943_p8), %s189_s5, 4294967168  ;;  %v225_v0 = vld [vmem:[%s183_s6] sm:$0xff]  ;;  %v226_v1 = vld [vmem:[%s192_s7] sm:$0xff]  ;;  %vm231_vm0 = vcmask 1043456   ;;  %vm297_vm1 = vcmask 1040384   ;;  %s449_s21 = sshll.u32 %s670_s12, 7 }
  0x57   : > { %v227_v2 = vmul.f32 %v226_v1, %v225_v0  ;;  %v246_v3 = vmul.f32 %v225_v0, %v225_v0  ;;  %v264_v4 = vmul.f32 %v226_v1, %v226_v1  ;;  %s217_s16 = scalar_lea.vmem [#allocation7], %s855_s18  ;;  %s880_s28 = scalar_lea.hbm %s931_s2, %s449_s21 }
  0x58   : > { %s327_s19 = sshll.u32 %s217_s16, 4  ;;  %s314_s29 = scalar_lea.sflag [#allocation4], %s852_s15  ;;  %s882_s19 = int_to_ptr.vmem [resolvable:$true] %s327_s19 }
  0x59   : > { %v248_v5 = vcombine.high %v246_v3, %v246_v3  ;;  %v250_v6 = vsel %vm231_vm0, %v246_v3, 0.0  ;;  %v266_v8 = vcombine.high %v264_v4, %v264_v4  ;;  %v268_v9 = vsel %vm231_vm0, %v264_v4, 0.0  ;;  %s592_s25 = scalar_lea.vmem %s882_s19, 128  ;;  %p944_p5 = scmp.ne.s32.totalorder %s936_s22, 0 }
  0x5a   : > { %v251_v7 = vrot.slane %v250_v6, 4  ;;  %v229_v10 = vcombine.high %v227_v2, %v227_v2  ;;  %v232_v11 = vsel %vm231_vm0, %v227_v2, 0.0  ;;  %v269_v13 = vrot.slane %v268_v9, 4  ;;  %p593_p0 = scmp.ne.s32.totalorder %s882_s19, %s592_s25  ;;  %s682_s12 = smov [#allocation7]  }
  0x5b   : > { %v257_v12 = vsel %vm231_vm0, %v248_v5, 0.0  ;;  %v275_v17 = vsel %vm231_vm0, %v266_v8, 0.0  ;;  %v233_v18 = vrot.slane %v232_v11, 4  ;;  %s596_s26 = sshll.u32 %s682_s12, 4  ;;  %s597_s26 = int_to_ptr.vmem [resolvable:$false] %s596_s26 }
  0x5c   : > { %v252_v14 = vadd.f32 %v251_v7, %v250_v6  ;;  %v258_v15 = vrot.slane %v257_v12, 4  ;;  %v270_v16 = vadd.f32 %v269_v13, %v268_v9  ;;  %v239_v21 = vsel %vm231_vm0, %v229_v10, 0.0  ;;  %p594_p7 = pnand %p593_p0, %p944_p5  ;;  %s598_s3 = scalar_lea.vmem %s597_s26, 256 }
  0x5d   : > { %v276_v23 = vrot.slane %v275_v17, 4  ;;  %v234_v28 = vadd.f32 %v233_v18, %v232_v11  ;;  %v240_v29 = vrot.slane %v239_v21, 4  ;;  %p599_p10 = scmp.lt.s32.totalorder %s882_s19, %s597_s26  ;;  %p600_p12 = scmp.lt.s32.totalorder %s598_s3, %s592_s25 }
  0x5e   : > { %v253_v19 = vrot.slane %v252_v14, 2  ;;  %v259_v20 = vadd.f32 %v258_v15, %v257_v12  ;;  %v271_v22 = vrot.slane %v270_v16, 2  ;;  %p595_p4 = pneg %p594_p7 }
  0x5f   : > { %v277_v27 = vadd.f32 %v276_v23, %v275_v17  ;;  %v235_v38 = vrot.slane %v234_v28, 2  ;;  %v241_v39 = vadd.f32 %v240_v29, %v239_v21  ;;  %p601_p1 = por %p600_p12, %p599_p10 }
  0x60   : > { %v254_v24 = vadd.f32 %v253_v19, %v252_v14  ;;  %v260_v25 = vrot.slane %v259_v20, 2  ;;  %v272_v26 = vadd.f32 %v271_v22, %v270_v16 }
  0x61   : > { %v278_v33 = vrot.slane %v277_v27, 2  ;;  %v236_v46 = vadd.f32 %v235_v38, %v234_v28  ;;  %v242_v47 = vrot.slane %v241_v39, 2  ;;  %p602_p2 = pnand %p601_p1, %p595_p4 }
  0x62   : > { %v255_v30 = vrot.slane %v254_v24, 1  ;;  %v261_v31 = vadd.f32 %v260_v25, %v259_v20  ;;  %v273_v32 = vrot.slane %v272_v26, 1 }
  0x63   : > { %v279_v37 = vadd.f32 %v278_v33, %v277_v27  ;;  %v237_v49 = vrot.slane %v236_v46, 1  ;;  %v243_v50 = vadd.f32 %v242_v47, %v241_v39 }
  0x64   : > { %v256_v34 = vadd.f32 %v255_v30, %v254_v24  ;;  %v262_v35 = vrot.slane %v261_v31, 1  ;;  %v274_v36 = vadd.f32 %v273_v32, %v272_v26 }
  0x65   : > { %v280_v42 = vrot.slane %v279_v37, 1  ;;  %v238_v52 = vadd.f32 %v237_v49, %v236_v46  ;;  %v244_v53 = vrot.slane %v243_v50, 1 }
  0x66   : > { %v263_v40 = vadd.f32 %v262_v35, %v261_v31  ;;  %v282_v41 = vmax.f32 %v256_v34, 1e-16  ;;  %v286_v43 = vmax.f32 %v274_v36, 1e-16 }
  0x67   : > { %v281_v45 = vadd.f32 %v280_v42, %v279_v37  ;;  %v245_v57 = vadd.f32 %v244_v53, %v243_v50 }
  0x68   : > { %v283_v44 = vmax.f32 %v263_v40, 1e-16  ;;  %524 = vrsqrt.f32 %v282_v41 }
  0x69   : > { %526 = vrsqrt.f32 %v286_v43  ;;  %v287_v48 = vmax.f32 %v281_v45, 1e-16 }
  0x6a   : > { %528 = vrsqrt.f32 %v283_v44 }
  0x6b   : > { %530 = vrsqrt.f32 %v287_v48 }
  0x72   : > { %v525_v51 = vpop.eup %524 }
  0x73   : > { %v527_v54 = vpop.eup %526 }
  0x74   : > { %v290_v55 = vmul.f32 %v527_v54, %v525_v51  ;;  %v529_v56 = vpop.eup %528 }
  0x75   : > { %v531_v59 = vpop.eup %530 }
  0x76   : > { %v292_v58 = vmul.f32 %v290_v55, %v238_v52  ;;  %v291_v60 = vmul.f32 %v531_v59, %v529_v56 }
  0x78   : > { %v294_v61 = vsub.f32 1.0, %v292_v58  ;;  %v293_v62 = vmul.f32 %v291_v60, %v245_v57 }
  0x7a   : > { %v295_v63 = vsub.f32 1.0, %v293_v62  ;;  %v298_v0 = vsel %vm297_vm1, %v294_v61, 0.0 }
  0x7c   : > { %v299_v1 = vsel %vm297_vm1, %v295_v63, 0.0 }
  0x7d   : > { %v300_v2 = vadd.f32 %v299_v1, %v298_v0 }
  0x7f   : > { %301 = vadd.xlane.f32.xlu0 %v300_v2 }
 0x10c   : > { %v302_v3 = vpop.xlane.xlu0 %301 }
 0x10d   : > { %v303_v4 = vrot.slane %v302_v3, 4 }
 0x10f   : > { %v304_v5 = vadd.f32 %v303_v4, %v302_v3 }
 0x111   : > { %v305_v6 = vrot.slane %v304_v5, 2 }
 0x113   : > { %v306_v7 = vadd.f32 %v305_v6, %v304_v5 }
 0x115   : > { %v307_v8 = vrot.slane %v306_v7, 1 }
 0x117   : > { %v308_v9 = vadd.f32 %v307_v8, %v306_v7 }
 0x119   : > { %454 = vpush %v308_v9 }
 0x14a   : > { %s455_s30 = spop %454 }
 0x14b   : > { %v310_v10 = vstv %s455_s30 }
 0x14c   : > { %312 = vst [vmem:[%s217_s16] sm:$0xff] %v310_v10 }
 0x14d   : > { %605 = shalt.err (!%p602_p2)
}
 0x14e   : > { %s606_s8 = scalar_lea.hbm %s880_s28, 128  ;;  %s610_s4 = scalar_lea.hbm %s931_s2, 256 }
 0x14f   : > { %p607_p9 = scmp.ne.s32.totalorder %s880_s28, %s606_s8  ;;  %p611_p6 = scmp.lt.u32.totalorder %s880_s28, %s931_s2 }
 0x150   : > { %p612_p13 = scmp.lt.u32.totalorder %s610_s4, %s606_s8  ;;  %p614_p0 = scmp.lt.u32.totalorder %s606_s8, %s880_s28 }
 0x151   : > { %p608_p11 = pnand %p607_p9, %p944_p5 }
 0x152   : > { %p613_p8 = por %p612_p13, %p611_p6 }
 0x153   : > { %p609_p3 = pneg %p608_p11 }
 0x154   : > { %p615_p7 = por %p614_p0, %p613_p8 }
 0x156   : > { %p616_p4 = pnand %p615_p7, %p609_p3 }
 0x158   : > { %619 = shalt.err (!%p616_p4)
}
 0x159   : > { %460 = dma.vmem_to_hbm [thread:$0]  (%p944_p5), %s882_s19, 128, %s880_s28, %s314_s29  }
 0x15a PF: > { %s339_s7 = sand.u32 1, %s658_s9   ;;  %p945_p10 = scmp.ne.s32.totalorder %s937_s24, 0 }
 0x15b   : > { %p946_p12 = scmp.ge.s32.totalorder %s678_s14, 2  ;;  %s340_s21 = scalar_lea.sflag [#allocation4], %s339_s7 }
 0x15d   : > { %p470_p1 = pnand %p946_p12, %p945_p10 }
 0x15f   : > { %653 = dma.done.wait (!%p470_p1), %s340_s21, 128  }
 0x160   : > { %655 = vsyncadd (!%p470_p1), %s340_s21, 4294967168  ;;  %s21_s14 = sadd.s32 1, %s678_s14   ;;  %s947_s9 = smov %s662_s10 }
 0x161   : > { %p18_p2 = scmp.ge.s32.totalorder %s21_s14, 4   ;;  %s948_s10 = smov %s666_s11 }
 0x162   : > { %s949_s11 = smov %s754_s23  ;;  %s950_s12 = smov %s674_s13 }
 0x163   : > { %s951_s13 = smov %s953_s17  ;;  %20 = sbr.rel (!%p18_p2) target bundleno = 8 (0x8), region = 90 }
 0x16a   :  { %345 = vsyncpa [#allocation3], 1 }
 0x16b   :  { %347 = vsyncpa [#allocation3 + $0x1], 1 }
 0x16c   :  { %348 = vsyncpa [#allocation6], 1 }
 0x16d   :  { %350 = vsyncpa [#allocation6 + $0x1], 1 }
 0x16e   :  { %351 = vsyncpa [#allocation4], 1 }
 0x16f   :  { %353 = vsyncpa [#allocation4 + $0x1], 1 }

</bundles_post_ra>
